<compile_context>
chip_gen: v7x
topology: tpu7x:2x2x1
jax: 0.10.0
libtpu: 0.0.40
codegen_flags: <defaults>
</compile_context>

<pallas_src>
import math
import jax
import jax.numpy as jnp
from jax.experimental import pallas as pl
from jax.experimental.pallas import tpu as pltpu

# ----------------------------------------------------------------------------
# Synthetic config (mirrors AutoEncoder.__init__ structure, small shapes)
# ----------------------------------------------------------------------------
CFG = {
    "in_channels": 4,
    "in_dim": 16,        # final nn.Upsample target spatial size
    "latent_dim": 8,     # encoder nn.Upsample target spatial size
    "encoder_blocks": [  # ConvBlockLegacy (Conv2d 1x1 + BN + LeakyReLU)
        {"out_channels": 8,  "negative_slope": 0.01},
        {"out_channels": 16, "negative_slope": 0.01},
    ],
    "decoder_blocks": [  # ConvBlockLegacy (ConvTranspose2d 1x1 + BN + LeakyReLU)
        {"out_channels": 8, "negative_slope": 0.01},
        {"out_channels": 4, "negative_slope": 0.01},
    ],
    # last_conv2d: Conv2d(out, out, kernel_size=1, stride=1, padding=0)
}

# ----------------------------------------------------------------------------
# Bilinear interpolation matrix (PyTorch nn.Upsample, mode='bilinear',
# align_corners=False, no antialias)
# ----------------------------------------------------------------------------
def _bilinear_matrix(out_size, in_size):
    i = jnp.arange(out_size, dtype=jnp.float32)
    scale = in_size / out_size
    src = (i + 0.5) * scale - 0.5
    src = jnp.clip(src, 0.0, float(in_size - 1))
    lo = jnp.floor(src).astype(jnp.int32)
    hi = jnp.minimum(lo + 1, in_size - 1)
    frac = src - lo.astype(jnp.float32)
    A = jnp.zeros((out_size, in_size), dtype=jnp.float32)
    rows = jnp.arange(out_size)
    A = A.at[rows, lo].add(1.0 - frac)
    A = A.at[rows, hi].add(frac)
    return A

# ----------------------------------------------------------------------------
# Single fused Pallas kernel: whole forward pass, VMEM resident
# ----------------------------------------------------------------------------
def _full_spec(shape):
    nd = len(shape)
    return pl.BlockSpec(tuple(shape), lambda i, _n=nd: (0,) * _n)


def fused_forward_call(x_cm, stages):
    """x_cm: (C_in, M_in) channels-major activation (M = N*H*W flattened).

    stages: sequence of
       ("conv",   W (Cout, Cin) float32, b (Cout, 1) float32, alpha-or-None)
       ("resize", R_T (M_in, M_out) float32)   # h <- h @ R_T
    All operands are tiny (total < 1 MiB), so a single grid step with
    full-array blocks keeps everything in VMEM for the whole forward.
    NOTE: at real (scaled-up) sizes the dense resize operator and the single
    unblocked M would not fit; there you would tile M, mark it "parallel" and
    use the separable per-plane resize instead.
    """
    operands = [x_cm]
    c, m = x_cm.shape
    for st in stages:
        if st[0] == "conv":
            operands += [st[1], st[2]]
            c = st[1].shape[0]
        else:
            operands += [st[1]]
            m = st[1].shape[1]
    out_shape = (c, m)

    def kernel(*refs):
        o_ref = refs[-1]
        h = refs[0][...]
        idx = 1
        for st in stages:
            if st[0] == "conv":
                w_ref, b_ref = refs[idx], refs[idx + 1]
                idx += 2
                h = jnp.dot(w_ref[...], h,
                            preferred_element_type=jnp.float32) + b_ref[...]
                alpha = st[3]
                if alpha is not None:                      # LeakyReLU
                    h = jnp.where(h >= 0.0, h, alpha * h)
            else:                                          # bilinear resize
                r_ref = refs[idx]
                idx += 1
                h = jnp.dot(h, r_ref[...], preferred_element_type=jnp.float32)
        o_ref[...] = h

    return pl.pallas_call(
        kernel,
        out_shape=jax.ShapeDtypeStruct(out_shape, jnp.float32),
        grid=(1,),
        in_specs=[_full_spec(op.shape) for op in operands],
        out_specs=_full_spec(out_shape),
        compiler_params=pltpu.CompilerParams(
            dimension_semantics=("arbitrary",)),
    )(*operands)

# ----------------------------------------------------------------------------
# Deterministic parameter construction (BN folded into the 1x1 convs)
# ----------------------------------------------------------------------------
def _init_block(key, cin, cout, transpose):
    k1, k2, k3, k4 = jax.random.split(key, 4)
    bound = 1.0 / math.sqrt(cin)  # 1x1 kernel
    if transpose:
        # nn.ConvTranspose2d weight: (Cin, Cout, 1, 1) -> (Cout, Cin)
        w = jax.random.uniform(k1, (cin, cout, 1, 1), minval=-bound, maxval=bound)
        w_oc = w[:, :, 0, 0].T
    else:
        # nn.Conv2d weight: (Cout, Cin, 1, 1) -> (Cout, Cin)
        w = jax.random.uniform(k1, (cout, cin, 1, 1), minval=-bound, maxval=bound)
        w_oc = w[:, :, 0, 0]
    bias = jax.random.uniform(k2, (cout,), minval=-bound, maxval=bound)
    # BatchNorm2d (eval mode) parameters, deterministic & non-trivial.
    gamma = 1.0 + 0.1 * jax.random.normal(k3, (cout,))
    beta = 0.1 * jax.random.normal(k4, (cout,))
    running_mean = jnp.zeros((cout,), jnp.float32)
    running_var = jnp.ones((cout,), jnp.float32)
    eps = 1e-5
    scale = gamma / jnp.sqrt(running_var + eps)
    shift = beta - running_mean * scale
    # Fold BN into the conv: y = scale*(W@x + b) + shift = W'@x + b'
    w_folded = (w_oc * scale[:, None]).astype(jnp.float32)
    b_folded = (bias * scale + shift).astype(jnp.float32)
    return w_folded, b_folded


def build_params(cfg, seed=42):
    key = jax.random.PRNGKey(seed)
    params = {"encoder": [], "decoder": []}
    cin = cfg["in_channels"]
    for blk in cfg["encoder_blocks"]:
        key, sub = jax.random.split(key)
        params["encoder"].append(
            (_init_block(sub, cin, blk["out_channels"], transpose=False),
             blk["negative_slope"]))
        cin = blk["out_channels"]
    for blk in cfg["decoder_blocks"]:
        key, sub = jax.random.split(key)
        params["decoder"].append(
            (_init_block(sub, cin, blk["out_channels"], transpose=True),
             blk["negative_slope"]))
        cin = blk["out_channels"]
    # last plain Conv2d (no BN, no activation); weight (Cout, Cin, 1, 1)
    key, k1, k2 = jax.random.split(key, 3)
    bound = 1.0 / math.sqrt(cin)
    w = jax.random.uniform(k1, (cin, cin, 1, 1), minval=-bound, maxval=bound)
    b = jax.random.uniform(k2, (cin,), minval=-bound, maxval=bound)
    params["last_conv"] = (w[:, :, 0, 0].astype(jnp.float32), b.astype(jnp.float32))
    return params

# ----------------------------------------------------------------------------
# Forward pass (same layer order as AutoEncoder.forward), single pallas_call
# ----------------------------------------------------------------------------
def autoencoder_forward(params, x, cfg):
    N, C, H, W = x.shape
    L, D = cfg["latent_dim"], cfg["in_dim"]

    # Boundary-only layout change: channels-major (C, N*H*W), m = n*H*W + h*W + w
    x_cm = jnp.transpose(x, (1, 0, 2, 3)).reshape(C, N * H * W).astype(jnp.float32)

    # Bilinear resizes as a single right-matmul with (I_N ⊗ A_h ⊗ A_w)^T.
    eye_n = jnp.eye(N, dtype=jnp.float32)
    R_enc_T = jnp.kron(eye_n, jnp.kron(_bilinear_matrix(L, H),
                                       _bilinear_matrix(L, W))).T   # (N*H*W, N*L*L)
    R_dec_T = jnp.kron(eye_n, jnp.kron(_bilinear_matrix(D, L),
                                       _bilinear_matrix(D, L))).T   # (N*L*L, N*D*D)

    stages = []
    for (w, b), a in params["encoder"]:
        stages.append(("conv", w, b.reshape(-1, 1), a))
    stages.append(("resize", R_enc_T))
    for (w, b), a in params["decoder"]:
        stages.append(("conv", w, b.reshape(-1, 1), a))
    w5, b5 = params["last_conv"]
    stages.append(("conv", w5, b5.reshape(-1, 1), None))   # no BN / activation
    stages.append(("resize", R_dec_T))

    out_cm = fused_forward_call(x_cm, stages)              # (Cout, N*D*D)
    c_out = out_cm.shape[0]
    return out_cm.reshape(c_out, N, D, D).transpose(1, 0, 2, 3)

# ----------------------------------------------------------------------------
# Pure-JAX reference (per-layer, NCHW) for correctness check
# ----------------------------------------------------------------------------
def reference_forward(params, x, cfg):
    hp = jax.lax.Precision.HIGHEST

    def conv(h, w, b, alpha):
        y = jnp.einsum('oc,nchw->nohw', w, h, precision=hp) + b.reshape(1, -1, 1, 1)
        return y if alpha is None else jnp.where(y >= 0.0, y, alpha * y)

    def resize(h, oh, ow):
        Ah = _bilinear_matrix(oh, h.shape[2])
        Aw = _bilinear_matrix(ow, h.shape[3])
        h = jnp.einsum('oh,nchw->ncow', Ah, h, precision=hp)
        return jnp.einsum('pw,nchw->nchp', Aw, h, precision=hp)

    h = x.astype(jnp.float32)
    for (w, b), a in params["encoder"]:
        h = conv(h, w, b, a)
    h = resize(h, cfg["latent_dim"], cfg["latent_dim"])
    for (w, b), a in params["decoder"]:
        h = conv(h, w, b, a)
    w, b = params["last_conv"]
    h = conv(h, w, b, None)
    h = resize(h, cfg["in_dim"], cfg["in_dim"])
    return h


if __name__ == "__main__":
    N, C, H, W = 2, CFG["in_channels"], CFG["in_dim"], CFG["in_dim"]
    x = jax.random.normal(jax.random.PRNGKey(0), (N, C, H, W), dtype=jnp.float32)
    params = build_params(CFG)

    fwd = jax.jit(lambda inp: autoencoder_forward(params, inp, CFG))
    out = fwd(x)
    jax.block_until_ready(out)

    assert out.shape == (N, CFG["decoder_blocks"][-1]["out_channels"],
                         CFG["in_dim"], CFG["in_dim"])
    assert out.dtype == jnp.float32

    ref = reference_forward(params, x, CFG)
    max_err = float(jnp.max(jnp.abs(out - ref)))
    assert max_err < 1e-2, f"mismatch vs reference: {max_err}"

    print("KERNEL_OK")
</pallas_src>

<mosaic_0001>
module attributes {stable_mosaic.version = 11 : i64} {
  func.func private @main(%arg0: i32) attributes {dimension_semantics = [#tpu.dimension_semantics<core_parallel>], iteration_bounds = array<i64: 2>, tpu.core_type = #tpu.core_type<sc_scalar_subcore>, window_params = []} {
    return
  }
}

module attributes {stable_mosaic.version = 11 : i64} {
  func.func private @main(%arg0: i32) attributes {dimension_semantics = [#tpu.dimension_semantics<core_parallel>], iteration_bounds = array<i64: 2>, tpu.core_type = #tpu.core_type<sc_scalar_subcore>, window_params = []} {
    return
  }
}

module attributes {stable_mosaic.version = 11 : i64} {
  func.func @kernel(%arg0: i32, %arg1: memref<4x512xf32, #tpu.memory_space<vmem>>, %arg2: memref<8x4xf32, #tpu.memory_space<vmem>>, %arg3: memref<8x1xf32, #tpu.memory_space<vmem>>, %arg4: memref<16x8xf32, #tpu.memory_space<vmem>>, %arg5: memref<16x1xf32, #tpu.memory_space<vmem>>, %arg6: memref<512x128xf32, #tpu.memory_space<vmem>>, %arg7: memref<8x16xf32, #tpu.memory_space<vmem>>, %arg8: memref<8x1xf32, #tpu.memory_space<vmem>>, %arg9: memref<4x8xf32, #tpu.memory_space<vmem>>, %arg10: memref<4x1xf32, #tpu.memory_space<vmem>>, %arg11: memref<4x4xf32, #tpu.memory_space<vmem>>, %arg12: memref<4x1xf32, #tpu.memory_space<vmem>>, %arg13: memref<128x512xf32, #tpu.memory_space<vmem>>, %arg14: memref<4x512xf32, #tpu.memory_space<vmem>>) attributes {dimension_semantics = [#tpu.dimension_semantics<arbitrary>], iteration_bounds = array<i64: 1>, scalar_prefetch = 0 : i64, scratch_operands = 0 : i64, tpu.core_type = #tpu.core_type<tc>, window_params = [{pipeline_mode = #tpu.pipeline_mode<synchronous>, transform_indices = @transform_0, window_bounds = array<i64: 4, 512>}, {pipeline_mode = #tpu.pipeline_mode<synchronous>, transform_indices = @transform_1, window_bounds = array<i64: 8, 4>}, {pipeline_mode = #tpu.pipeline_mode<synchronous>, transform_indices = @transform_2, window_bounds = array<i64: 8, 1>}, {pipeline_mode = #tpu.pipeline_mode<synchronous>, transform_indices = @transform_3, window_bounds = array<i64: 16, 8>}, {pipeline_mode = #tpu.pipeline_mode<synchronous>, transform_indices = @transform_4, window_bounds = array<i64: 16, 1>}, {pipeline_mode = #tpu.pipeline_mode<synchronous>, transform_indices = @transform_5, window_bounds = array<i64: 512, 128>}, {pipeline_mode = #tpu.pipeline_mode<synchronous>, transform_indices = @transform_6, window_bounds = array<i64: 8, 16>}, {pipeline_mode = #tpu.pipeline_mode<synchronous>, transform_indices = @transform_7, window_bounds = array<i64: 8, 1>}, {pipeline_mode = #tpu.pipeline_mode<synchronous>, transform_indices = @transform_8, window_bounds = array<i64: 4, 8>}, {pipeline_mode = #tpu.pipeline_mode<synchronous>, transform_indices = @transform_9, window_bounds = array<i64: 4, 1>}, {pipeline_mode = #tpu.pipeline_mode<synchronous>, transform_indices = @transform_10, window_bounds = array<i64: 4, 4>}, {pipeline_mode = #tpu.pipeline_mode<synchronous>, transform_indices = @transform_11, window_bounds = array<i64: 4, 1>}, {pipeline_mode = #tpu.pipeline_mode<synchronous>, transform_indices = @transform_12, window_bounds = array<i64: 128, 512>}, {pipeline_mode = #tpu.pipeline_mode<synchronous>, transform_indices = @transform_13, window_bounds = array<i64: 4, 512>}]} {
    %c0 = arith.constant 0 : index
    %c0_0 = arith.constant 0 : index
    %0 = vector.load %arg1[%c0, %c0_0] : memref<4x512xf32, #tpu.memory_space<vmem>>, vector<4x512xf32>
    %c0_1 = arith.constant 0 : index
    %c0_2 = arith.constant 0 : index
    %1 = vector.load %arg2[%c0_1, %c0_2] : memref<8x4xf32, #tpu.memory_space<vmem>>, vector<8x4xf32>
    %cst = arith.constant dense<0.000000e+00> : vector<8x512xf32>
    %2 = tpu.matmul %1, %0, %cst {dimension_numbers = #tpu.dot_dimension_numbers<[1], [0], [0], [1], [0, 0, 1, 1], [], []>} : vector<8x4xf32>, vector<4x512xf32>, vector<8x512xf32> -> vector<8x512xf32>
    %c0_3 = arith.constant 0 : index
    %c0_4 = arith.constant 0 : index
    %3 = vector.load %arg3[%c0_3, %c0_4] : memref<8x1xf32, #tpu.memory_space<vmem>>, vector<8x1xf32>
    %4 = vector.broadcast %3 : vector<8x1xf32> to vector<8x512xf32>
    %5 = arith.addf %2, %4 : vector<8x512xf32>
    %cst_5 = arith.constant 0.000000e+00 : f32
    %6 = vector.broadcast %cst_5 : f32 to vector<8x512xf32>
    %7 = arith.cmpf oge, %5, %6 : vector<8x512xf32>
    %cst_6 = arith.constant 0.00999999977 : f32
    %8 = vector.broadcast %cst_6 : f32 to vector<8x512xf32>
    %9 = arith.mulf %8, %5 : vector<8x512xf32>
    %10 = arith.select %7, %5, %9 : vector<8x512xi1>, vector<8x512xf32>
    %c0_7 = arith.constant 0 : index
    %c0_8 = arith.constant 0 : index
    %11 = vector.load %arg4[%c0_7, %c0_8] : memref<16x8xf32, #tpu.memory_space<vmem>>, vector<16x8xf32>
    %cst_9 = arith.constant dense<0.000000e+00> : vector<16x512xf32>
    %12 = tpu.matmul %11, %10, %cst_9 {dimension_numbers = #tpu.dot_dimension_numbers<[1], [0], [0], [1], [0, 0, 1, 1], [], []>} : vector<16x8xf32>, vector<8x512xf32>, vector<16x512xf32> -> vector<16x512xf32>
    %c0_10 = arith.constant 0 : index
    %c0_11 = arith.constant 0 : index
    %13 = vector.load %arg5[%c0_10, %c0_11] : memref<16x1xf32, #tpu.memory_space<vmem>>, vector<16x1xf32>
    %14 = vector.broadcast %13 : vector<16x1xf32> to vector<16x512xf32>
    %15 = arith.addf %12, %14 : vector<16x512xf32>
    %cst_12 = arith.constant 0.000000e+00 : f32
    %16 = vector.broadcast %cst_12 : f32 to vector<16x512xf32>
    %17 = arith.cmpf oge, %15, %16 : vector<16x512xf32>
    %cst_13 = arith.constant 0.00999999977 : f32
    %18 = vector.broadcast %cst_13 : f32 to vector<16x512xf32>
    %19 = arith.mulf %18, %15 : vector<16x512xf32>
    %20 = arith.select %17, %15, %19 : vector<16x512xi1>, vector<16x512xf32>
    %c0_14 = arith.constant 0 : index
    %c0_15 = arith.constant 0 : index
    %21 = vector.load %arg6[%c0_14, %c0_15] : memref<512x128xf32, #tpu.memory_space<vmem>>, vector<512x128xf32>
    %cst_16 = arith.constant dense<0.000000e+00> : vector<16x128xf32>
    %22 = tpu.matmul %20, %21, %cst_16 {dimension_numbers = #tpu.dot_dimension_numbers<[1], [0], [0], [1], [0, 0, 1, 1], [], []>} : vector<16x512xf32>, vector<512x128xf32>, vector<16x128xf32> -> vector<16x128xf32>
    %c0_17 = arith.constant 0 : index
    %c0_18 = arith.constant 0 : index
    %23 = vector.load %arg7[%c0_17, %c0_18] : memref<8x16xf32, #tpu.memory_space<vmem>>, vector<8x16xf32>
    %cst_19 = arith.constant dense<0.000000e+00> : vector<8x128xf32>
    %24 = tpu.matmul %23, %22, %cst_19 {dimension_numbers = #tpu.dot_dimension_numbers<[1], [0], [0], [1], [0, 0, 1, 1], [], []>} : vector<8x16xf32>, vector<16x128xf32>, vector<8x128xf32> -> vector<8x128xf32>
    %c0_20 = arith.constant 0 : index
    %c0_21 = arith.constant 0 : index
    %25 = vector.load %arg8[%c0_20, %c0_21] : memref<8x1xf32, #tpu.memory_space<vmem>>, vector<8x1xf32>
    %26 = vector.broadcast %25 : vector<8x1xf32> to vector<8x128xf32>
    %27 = arith.addf %24, %26 : vector<8x128xf32>
    %cst_22 = arith.constant 0.000000e+00 : f32
    %28 = vector.broadcast %cst_22 : f32 to vector<8x128xf32>
    %29 = arith.cmpf oge, %27, %28 : vector<8x128xf32>
    %cst_23 = arith.constant 0.00999999977 : f32
    %30 = vector.broadcast %cst_23 : f32 to vector<8x128xf32>
    %31 = arith.mulf %30, %27 : vector<8x128xf32>
    %32 = arith.select %29, %27, %31 : vector<8x128xi1>, vector<8x128xf32>
    %c0_24 = arith.constant 0 : index
    %c0_25 = arith.constant 0 : index
    %33 = vector.load %arg9[%c0_24, %c0_25] : memref<4x8xf32, #tpu.memory_space<vmem>>, vector<4x8xf32>
    %cst_26 = arith.constant dense<0.000000e+00> : vector<4x128xf32>
    %34 = tpu.matmul %33, %32, %cst_26 {dimension_numbers = #tpu.dot_dimension_numbers<[1], [0], [0], [1], [0, 0, 1, 1], [], []>} : vector<4x8xf32>, vector<8x128xf32>, vector<4x128xf32> -> vector<4x128xf32>
    %c0_27 = arith.constant 0 : index
    %c0_28 = arith.constant 0 : index
    %35 = vector.load %arg10[%c0_27, %c0_28] : memref<4x1xf32, #tpu.memory_space<vmem>>, vector<4x1xf32>
    %36 = vector.broadcast %35 : vector<4x1xf32> to vector<4x128xf32>
    %37 = arith.addf %34, %36 : vector<4x128xf32>
    %cst_29 = arith.constant 0.000000e+00 : f32
    %38 = vector.broadcast %cst_29 : f32 to vector<4x128xf32>
    %39 = arith.cmpf oge, %37, %38 : vector<4x128xf32>
    %cst_30 = arith.constant 0.00999999977 : f32
    %40 = vector.broadcast %cst_30 : f32 to vector<4x128xf32>
    %41 = arith.mulf %40, %37 : vector<4x128xf32>
    %42 = arith.select %39, %37, %41 : vector<4x128xi1>, vector<4x128xf32>
    %c0_31 = arith.constant 0 : index
    %c0_32 = arith.constant 0 : index
    %43 = vector.load %arg11[%c0_31, %c0_32] : memref<4x4xf32, #tpu.memory_space<vmem>>, vector<4x4xf32>
    %cst_33 = arith.constant dense<0.000000e+00> : vector<4x128xf32>
    %44 = tpu.matmul %43, %42, %cst_33 {dimension_numbers = #tpu.dot_dimension_numbers<[1], [0], [0], [1], [0, 0, 1, 1], [], []>} : vector<4x4xf32>, vector<4x128xf32>, vector<4x128xf32> -> vector<4x128xf32>
    %c0_34 = arith.constant 0 : index
    %c0_35 = arith.constant 0 : index
    %45 = vector.load %arg12[%c0_34, %c0_35] : memref<4x1xf32, #tpu.memory_space<vmem>>, vector<4x1xf32>
    %46 = vector.broadcast %45 : vector<4x1xf32> to vector<4x128xf32>
    %47 = arith.addf %44, %46 : vector<4x128xf32>
    %c0_36 = arith.constant 0 : index
    %c0_37 = arith.constant 0 : index
    %48 = vector.load %arg13[%c0_36, %c0_37] : memref<128x512xf32, #tpu.memory_space<vmem>>, vector<128x512xf32>
    %cst_38 = arith.constant dense<0.000000e+00> : vector<4x512xf32>
    %49 = tpu.matmul %47, %48, %cst_38 {dimension_numbers = #tpu.dot_dimension_numbers<[1], [0], [0], [1], [0, 0, 1, 1], [], []>} : vector<4x128xf32>, vector<128x512xf32>, vector<4x512xf32> -> vector<4x512xf32>
    %c0_39 = arith.constant 0 : index
    %c0_40 = arith.constant 0 : index
    %50 = vector.load %arg14[%c0_39, %c0_40] : memref<4x512xf32, #tpu.memory_space<vmem>>, vector<4x512xf32>
    tpu.vector_store %arg14[%c0_39, %c0_40], %49 {strides = array<i32>} : memref<4x512xf32, #tpu.memory_space<vmem>>, vector<4x512xf32>,
    return
  }
  func.func @transform_0(%arg0: i32) -> (i32, i32) {
    %c0_i32 = arith.constant 0 : i32
    %c0_i32_0 = arith.constant 0 : i32
    %c0_i32_1 = arith.constant 0 : i32
    return %c0_i32, %c0_i32_0 : i32, i32
  }
  func.func @transform_1(%arg0: i32) -> (i32, i32) {
    %c0_i32 = arith.constant 0 : i32
    %c0_i32_0 = arith.constant 0 : i32
    %c0_i32_1 = arith.constant 0 : i32
    return %c0_i32, %c0_i32_0 : i32, i32
  }
  func.func @transform_2(%arg0: i32) -> (i32, i32) {
    %c0_i32 = arith.constant 0 : i32
    %c0_i32_0 = arith.constant 0 : i32
    %c0_i32_1 = arith.constant 0 : i32
    return %c0_i32, %c0_i32_0 : i32, i32
  }
  func.func @transform_3(%arg0: i32) -> (i32, i32) {
    %c0_i32 = arith.constant 0 : i32
    %c0_i32_0 = arith.constant 0 : i32
    %c0_i32_1 = arith.constant 0 : i32
    return %c0_i32, %c0_i32_0 : i32, i32
  }
  func.func @transform_4(%arg0: i32) -> (i32, i32) {
    %c0_i32 = arith.constant 0 : i32
    %c0_i32_0 = arith.constant 0 : i32
    %c0_i32_1 = arith.constant 0 : i32
    return %c0_i32, %c0_i32_0 : i32, i32
  }
  func.func @transform_5(%arg0: i32) -> (i32, i32) {
    %c0_i32 = arith.constant 0 : i32
    %c0_i32_0 = arith.constant 0 : i32
    %c0_i32_1 = arith.constant 0 : i32
    return %c0_i32, %c0_i32_0 : i32, i32
  }
  func.func @transform_6(%arg0: i32) -> (i32, i32) {
    %c0_i32 = arith.constant 0 : i32
    %c0_i32_0 = arith.constant 0 : i32
    %c0_i32_1 = arith.constant 0 : i32
    return %c0_i32, %c0_i32_0 : i32, i32
  }
  func.func @transform_7(%arg0: i32) -> (i32, i32) {
    %c0_i32 = arith.constant 0 : i32
    %c0_i32_0 = arith.constant 0 : i32
    %c0_i32_1 = arith.constant 0 : i32
    return %c0_i32, %c0_i32_0 : i32, i32
  }
  func.func @transform_8(%arg0: i32) -> (i32, i32) {
    %c0_i32 = arith.constant 0 : i32
    %c0_i32_0 = arith.constant 0 : i32
    %c0_i32_1 = arith.constant 0 : i32
    return %c0_i32, %c0_i32_0 : i32, i32
  }
  func.func @transform_9(%arg0: i32) -> (i32, i32) {
    %c0_i32 = arith.constant 0 : i32
    %c0_i32_0 = arith.constant 0 : i32
    %c0_i32_1 = arith.constant 0 : i32
    return %c0_i32, %c0_i32_0 : i32, i32
  }
  func.func @transform_10(%arg0: i32) -> (i32, i32) {
    %c0_i32 = arith.constant 0 : i32
    %c0_i32_0 = arith.constant 0 : i32
    %c0_i32_1 = arith.constant 0 : i32
    return %c0_i32, %c0_i32_0 : i32, i32
  }
  func.func @transform_11(%arg0: i32) -> (i32, i32) {
    %c0_i32 = arith.constant 0 : i32
    %c0_i32_0 = arith.constant 0 : i32
    %c0_i32_1 = arith.constant 0 : i32
    return %c0_i32, %c0_i32_0 : i32, i32
  }
  func.func @transform_12(%arg0: i32) -> (i32, i32) {
    %c0_i32 = arith.constant 0 : i32
    %c0_i32_0 = arith.constant 0 : i32
    %c0_i32_1 = arith.constant 0 : i32
    return %c0_i32, %c0_i32_0 : i32, i32
  }
  func.func @transform_13(%arg0: i32) -> (i32, i32) {
    %c0_i32 = arith.constant 0 : i32
    %c0_i32_0 = arith.constant 0 : i32
    %c0_i32_1 = arith.constant 0 : i32
    return %c0_i32, %c0_i32_0 : i32, i32
  }
}

</mosaic_0001>

<bundles_post_ra>
// kernel: _lambda_.1
= control target key start
LH: loop header
LB: loop body
LE: loop exit
PB: predicated region body
PF: predicated region fallthrough
CT: control target
= control target key end

     0   :  { %vm61_vm0 = vcmask 1043456   ;;  %v1360_v2 = vmov 0.0   ;;  %v1361_v5 = vmov 0   ;;  %vm57_vm1 = vcmask 31744   ;;  %s1897_s0 = inlined_call_operand.vmem [shape: f32[4,512], index: 0, kind: input, shape index: {}]   ;;  %s1898_s1 = inlined_call_operand.vmem [shape: f32[8,4], index: 1, kind: input, shape index: {}]   ;;  %s1899_s2 = inlined_call_operand.vmem [shape: f32[8,1], index: 2, kind: input, shape index: {}]   ;;  %s1900_s4 = inlined_call_operand.vmem [shape: f32[16,1], index: 4, kind: input, shape index: {}]   ;;  %s1901_s9 = inlined_call_operand.vmem [shape: f32[4,1], index: 9, kind: input, shape index: {}]   ;;  %s1902_s7 = inlined_call_operand.vmem [shape: f32[8,1], index: 7, kind: input, shape index: {}]   ;;  %s1903_s11 = inlined_call_operand.vmem [shape: f32[4,1], index: 11, kind: input, shape index: {}]   ;;  %s1904_s5 = inlined_call_operand.vmem [shape: f32[512,128], index: 5, kind: input, shape index: {}]   ;;  %s1905_s3 = inlined_call_operand.vmem [shape: f32[16,8], index: 3, kind: input, shape index: {}]   ;;  %s1906_s6 = inlined_call_operand.vmem [shape: f32[8,16], index: 6, kind: input, shape index: {}]   ;;  %s1907_s8 = inlined_call_operand.vmem [shape: f32[4,8], index: 8, kind: input, shape index: {}]   ;;  %s1908_s12 = inlined_call_operand.vmem [shape: f32[128,512], index: 12, kind: input, shape index: {}]   ;;  %s1909_s10 = inlined_call_operand.vmem [shape: f32[4,4], index: 10, kind: input, shape index: {}]   ;;  %s1910_s13 = inlined_call_operand.vmem [shape: f32[4,512], index: 13, kind: output, shape index: {}]  }
   0x1   :  { %v44_v0 = vld [vmem:[%s1897_s0] sm:$0xff]  ;;  %v45_v1 = vld [vmem:[%s1897_s0 + $0x8] sm:$0xff]  ;;  %134 = vmatprep.mubr.f32.mxu0 %v1360_v2  ;;  %205 = vmatprep.mubr.f32.mxu1 %v1360_v2  ;;  %vm238_vm6 = vcmask 64512   ;;  %v441_v38 = vld [vmem:[%s1904_s5 + $0x90] sm:$0xff]  ;;  %vm1363_vm15 = vmmov 0  }
   0x2   :  { %v55_v3 = vcombine.high %v44_v0, %v44_v0  ;;  %v56_v4 = vcombine.high %v45_v1, %v45_v1  ;;  %1356 = vset.pattern.permute.xlu0 %v1361_v5  ;;  %v47_v6 = vld [vmem:[%s1899_s2] sm:$0xff]  ;;  %1357 = vset.pattern.permute.xlu1 %v1361_v5  ;;  %v227_v10 = vld [vmem:[%s1900_s4 + $0x8] sm:$0xff]  ;;  %v442_v42 = vld [vmem:[%s1904_s5 + $0x98] sm:$0xff] }
   0x3   :  { %v46_v7 = vld [vmem:[%s1898_s1] sm:$0xff]  ;;  %50 = vperm.xlu0 %1356, %v47_v6   ;;  %235 = vperm.xlu1 %1357, %v227_v10   ;;  %v440_v23 = vld [vmem:[%s1904_s5 + $0x88] sm:$0xff]  ;;  %v473_v43 = vld [vmem:[%s1904_s5 + $0x190] sm:$0xff]  ;;  %v1225_v53 = vpack.c.bf16 %v442_v42, %v441_v38 }
   0x4   :  { %1107 = vmatprep.subr.msk.mxu0 %vm61_vm0, %v55_v3  ;;  %1110 = vmatprep.subr.msk.mxu1 %vm61_vm0, %v56_v4  ;;  %v226_v8 = vld [vmem:[%s1900_s4] sm:$0xff]  ;;  %v472_v25 = vld [vmem:[%s1904_s5 + $0x188] sm:$0xff]  ;;  %v474_v44 = vld [vmem:[%s1904_s5 + $0x198] sm:$0xff] }
   0x5   :  { %1108 = vmatpush1.msk.msra.mxu0 %vm61_vm0, %v44_v0  ;;  %1111 = vmatpush1.msk.msra.mxu1 %vm61_vm0, %v45_v1  ;;  %v722_v9 = vld [vmem:[%s1901_s9] sm:$0xf]  ;;  %v424_v31 = vld [vmem:[%s1904_s5 + $0x8] sm:$0xff]  ;;  %v425_v48 = vld [vmem:[%s1904_s5 + $0x10] sm:$0xff]  ;;  %v1257_v54 = vpack.c.bf16 %v474_v44, %v473_v43 }
   0x6   :  { %1109 = vmatmul.mubr.msk.f32.vlgmr.msra.gmra.mrb[0].mxu0 %vm57_vm1, %v46_v7  ;;  %1112 = vmatmul.mubr.msk.f32.vlgmr.msra.gmra.mrb[0].mxu1 %vm57_vm1, %v46_v7  ;;  %v638_v11 = vld [vmem:[%s1902_s7] sm:$0xff]  ;;  %v456_v33 = vld [vmem:[%s1904_s5 + $0x108] sm:$0xff]  ;;  %v426_v49 = vld [vmem:[%s1904_s5 + $0x18] sm:$0xff] }
   0x7   :  { %230 = vperm.xlu0 %1356, %v226_v8   ;;  %309 = vmatprep.mubr.f32.mxu0 %v1360_v2  ;;  %v805_v12 = vld [vmem:[%s1903_s11] sm:$0xf]  ;;  %v225_v45 = vld [vmem:[%s1905_s3 + $0x8] sm:$0xff]  ;;  %v457_v50 = vld [vmem:[%s1904_s5 + $0x110] sm:$0xff]  ;;  %v1227_v58 = vpack.c.bf16 %v426_v49, %v425_v48 }
   0x8   :  { %386 = vmatprep.mubr.f32.mxu1 %v1360_v2  ;;  %641 = vperm.xlu1 %1357, %v638_v11   ;;  %v439_v20 = vld [vmem:[%s1904_s5 + $0x80] sm:$0xff]  ;;  %v458_v51 = vld [vmem:[%s1904_s5 + $0x118] sm:$0xff]  ;;  %v444_v55 = vld [vmem:[%s1904_s5 + $0xa8] sm:$0xff] }
   0x9   :  { %v471_v24 = vld [vmem:[%s1904_s5 + $0x180] sm:$0xff]  ;;  %v1221_v37 = vpack.c.bf16 %v440_v23, %v439_v20  ;;  %v476_v57 = vld [vmem:[%s1904_s5 + $0x1a8] sm:$0xff]  ;;  %v1259_v59 = vpack.c.bf16 %v458_v51, %v457_v50  ;;  %v445_v3 = vld [vmem:[%s1904_s5 + $0xb0] sm:$0xff] }
   0xa   :  { %v423_v28 = vld [vmem:[%s1904_s5] sm:$0xff]  ;;  %v1253_v41 = vpack.c.bf16 %v472_v25, %v471_v24  ;;  %v428_v61 = vld [vmem:[%s1904_s5 + $0x28] sm:$0xff]  ;;  %v446_v4 = vld [vmem:[%s1904_s5 + $0xb8] sm:$0xff] }
   0xb   :  { %725 = vperm.xlu0 %1356, %v722_v9   ;;  %v455_v32 = vld [vmem:[%s1904_s5 + $0x100] sm:$0xff]  ;;  %v1223_v46 = vpack.c.bf16 %v424_v31, %v423_v28  ;;  %v460_v1 = vld [vmem:[%s1904_s5 + $0x128] sm:$0xff]  ;;  %v477_v5 = vld [vmem:[%s1904_s5 + $0x1b0] sm:$0xff]  ;;  %v1233_v11 = vpack.c.bf16 %v446_v4, %v445_v3 }
   0xc   :  { %808 = vperm.xlu1 %1357, %v805_v12   ;;  %v224_v36 = vld [vmem:[%s1905_s3] sm:$0xff]  ;;  %v1255_v47 = vpack.c.bf16 %v456_v33, %v455_v32  ;;  %v478_v6 = vld [vmem:[%s1904_s5 + $0x1b8] sm:$0xff]  ;;  %v429_v9 = vld [vmem:[%s1904_s5 + $0x30] sm:$0xff] }
   0xd   :  { %v443_v52 = vld [vmem:[%s1904_s5 + $0xa0] sm:$0xff]  ;;  %v430_v10 = vld [vmem:[%s1904_s5 + $0x38] sm:$0xff]  ;;  %v1265_v12 = vpack.c.bf16 %v478_v6, %v477_v5  ;;  %v433_v33 = vld [vmem:[%s1904_s5 + $0x50] sm:$0xff] }
   0xe   :  { %v475_v56 = vld [vmem:[%s1904_s5 + $0x1a0] sm:$0xff]  ;;  %v1229_v62 = vpack.c.bf16 %v444_v55, %v443_v52  ;;  %v450_v28 = vld [vmem:[%s1904_s5 + $0xd8] sm:$0xff]  ;;  %v452_v42 = vld [vmem:[%s1904_s5 + $0xe8] sm:$0xff] }
   0xf   :  { %v427_v60 = vld [vmem:[%s1904_s5 + $0x20] sm:$0xff]  ;;  %v1261_v63 = vpack.c.bf16 %v476_v57, %v475_v56  ;;  %v466_v38 = vld [vmem:[%s1904_s5 + $0x158] sm:$0xff]  ;;  %v468_v51 = vld [vmem:[%s1904_s5 + $0x168] sm:$0xff] }
  0x10   :  { %v459_v0 = vld [vmem:[%s1904_s5 + $0x120] sm:$0xff]  ;;  %v1231_v7 = vpack.c.bf16 %v428_v61, %v427_v60  ;;  %v485_v55 = vld [vmem:[%s1904_s5 + $0x1f0] sm:$0xff]  ;;  %v486_v57 = vld [vmem:[%s1904_s5 + $0x1f8] sm:$0xff] }
  0x11   :  { %v1263_v8 = vpack.c.bf16 %v460_v1, %v459_v0  ;;  %v463_v25 = vld [vmem:[%s1904_s5 + $0x140] sm:$0xff]  ;;  %v1281_v60 = vpack.c.bf16 %v486_v57, %v485_v55 }
  0x12   :  { %v483_v43 = vld [vmem:[%s1904_s5 + $0x1e0] sm:$0xff] }
  0x13   :  { %v467_v50 = vld [vmem:[%s1904_s5 + $0x160] sm:$0xff] }
  0x14   :  { %v1279_v52 = vpack.c.bf16 %v468_v51, %v467_v50 }
  0x82   :  { %v51_v13 = vpop.permute.xlu0 %50 }
  0x86   :  { %v231_v1 = vpop.permute.xlu0 %230 }
  0xd9   :  { %v136_v14 = vpop.f32.mrb[0].mxu0  ;;  %v207_v15 = vpop.f32.mrb[0].mxu1 }
  0xda   :  { %v137_v16 = vadd.f32 %v136_v14, %v51_v13  ;;  %v208_v17 = vadd.f32 %v207_v15, %v51_v13  ;;  %v138_v18 = vpop.f32.mrb[1].mxu0  ;;  %v209_v19 = vpop.f32.mrb[1].mxu1  ;;  %v462_v14 = vld [vmem:[%s1904_s5 + $0x138] sm:$0xff]  ;;  %v447_v15 = vld [vmem:[%s1904_s5 + $0xc0] sm:$0xff] }
  0xdb   :  { %v139_v21 = vadd.f32 %v138_v18, %v51_v13  ;;  %v210_v22 = vadd.f32 %v209_v19, %v51_v13  ;;  %v461_v13 = vld [vmem:[%s1904_s5 + $0x130] sm:$0xff]  ;;  %v480_v18 = vld [vmem:[%s1904_s5 + $0x1c8] sm:$0xff]  ;;  %v1235_v19 = vpack.c.bf16 %v430_v10, %v429_v9 }
  0xdc   :  { %vm212_vm2 = vcmp.ge.f32.partialorder %v137_v16, 0.0  ;;  %v216_v26 = vmul.f32 0.01, %v137_v16  ;;  %vm214_vm3 = vcmp.ge.f32.partialorder %v208_v17, 0.0  ;;  %v218_v27 = vmul.f32 0.01, %v208_v17 }
  0xdd   :  { %v217_v29 = vmul.f32 0.01, %v139_v21  ;;  %v219_v30 = vmul.f32 0.01, %v210_v22  ;;  %vm213_vm4 = vcmp.ge.f32.partialorder %v139_v21, 0.0  ;;  %vm215_vm5 = vcmp.ge.f32.partialorder %v210_v22, 0.0 }
  0xde   :  { %v220_v39 = vsel %vm212_vm2, %v137_v16, %v216_v26  ;;  %v222_v40 = vsel %vm214_vm3, %v208_v17, %v218_v27  ;;  %v448_v16 = vld [vmem:[%s1904_s5 + $0xc8] sm:$0xff]  ;;  %v479_v17 = vld [vmem:[%s1904_s5 + $0x1c0] sm:$0xff]  ;;  %v1267_v20 = vpack.c.bf16 %v462_v14, %v461_v13  ;;  %v449_v27 = vld [vmem:[%s1904_s5 + $0xd0] sm:$0xff]  ;;  %vm644_vm2 = vcmask 130048  }
  0xdf   :  { %v221_v34 = vsel %vm213_vm4, %v139_v21, %v217_v29  ;;  %v223_v35 = vsel %vm215_vm5, %v210_v22, %v219_v30  ;;  %v431_v21 = vld [vmem:[%s1904_s5 + $0x40] sm:$0xff]  ;;  %v432_v22 = vld [vmem:[%s1904_s5 + $0x48] sm:$0xff]  ;;  %v1237_v23 = vpack.c.bf16 %v448_v16, %v447_v15  ;;  %v1269_v24 = vpack.c.bf16 %v480_v18, %v479_v17  ;;  %v481_v29 = vld [vmem:[%s1904_s5 + $0x1d0] sm:$0xff] }
  0xe0   :  { %245 = vmatprep.subr.mxu0 %v221_v34  ;;  %322 = vmatprep.subr.mxu1 %v223_v35  ;;  %v464_v26 = vld [vmem:[%s1904_s5 + $0x148] sm:$0xff]  ;;  %v482_v30 = vld [vmem:[%s1904_s5 + $0x1d8] sm:$0xff]  ;;  %v1239_v31 = vpack.c.bf16 %v432_v22, %v431_v21  ;;  %v1241_v34 = vpack.c.bf16 %v450_v28, %v449_v27 }
  0xe1   :  { %246 = vmatpush1.msra.mxu0 %v220_v39  ;;  %323 = vmatpush1.msra.mxu1 %v222_v40  ;;  %v1271_v32 = vpack.c.bf16 %v464_v26, %v463_v25  ;;  %v1273_v35 = vpack.c.bf16 %v482_v30, %v481_v29 }
  0xe2   :  { %1113 = vmatmul.mubr.msk.f32.vlgmr.msra.gmra.mrb[2].mxu0 %vm238_vm6, %v224_v36  ;;  %1115 = vmatmul.mubr.msk.f32.vlgmr.msra.gmra.mrb[2].mxu1 %vm238_vm6, %v224_v36  ;;  %v434_v36 = vld [vmem:[%s1904_s5 + $0x58] sm:$0xff] }
  0xe3   :  { %315 = vmatprep.mubr.f32.mxu0 %v1360_v2  ;;  %392 = vmatprep.mubr.f32.mxu1 %v1360_v2  ;;  %v1243_v39 = vpack.c.bf16 %v434_v36, %v433_v33  ;;  %v1362_v36 = vmov 0.0|0.0  }
  0xe4   :  { %1222 = vmatprep.subr.bf16.mxu0 %v1221_v37  ;;  %1254 = vmatprep.subr.bf16.mxu1 %v1253_v41  ;;  %v465_v37 = vld [vmem:[%s1904_s5 + $0x150] sm:$0xff]  ;;  %v451_v41 = vld [vmem:[%s1904_s5 + $0xe0] sm:$0xff] }
  0xe5   :  { %1224 = vmatpush3.bf16.msra.mxu0 %v1223_v46  ;;  %1256 = vmatpush3.bf16.msra.mxu1 %v1255_v47  ;;  %v1275_v40 = vpack.c.bf16 %v466_v38, %v465_v37  ;;  %v1245_v44 = vpack.c.bf16 %v452_v42, %v451_v41  ;;  %v435_v46 = vld [vmem:[%s1904_s5 + $0x60] sm:$0xff]  ;;  %v436_v47 = vld [vmem:[%s1904_s5 + $0x68] sm:$0xff] }
  0xe6   :  { %1114 = vmatmul.mubr.msk.f32.gmra.mrb[4].mxu0 %vm238_vm6, %v225_v45  ;;  %1116 = vmatmul.mubr.msk.f32.gmra.mrb[4].mxu1 %vm238_vm6, %v225_v45  ;;  %v484_v45 = vld [vmem:[%s1904_s5 + $0x1e8] sm:$0xff]  ;;  %v1247_v49 = vpack.c.bf16 %v436_v47, %v435_v46 }
  0xe7   :  { %1226 = vmatprep.subr.bf16.mxu0 %v1225_v53  ;;  %1258 = vmatprep.subr.bf16.mxu1 %v1257_v54  ;;  %v1277_v48 = vpack.c.bf16 %v484_v45, %v483_v43  ;;  %v453_v53 = vld [vmem:[%s1904_s5 + $0xf0] sm:$0xff]  ;;  %v454_v54 = vld [vmem:[%s1904_s5 + $0xf8] sm:$0xff] }
  0xe8   :  { %v1249_v56 = vpack.c.bf16 %v454_v54, %v453_v53 }
  0xe9   :  { %1228 = vmatpush3.bf16.msra.mxu0 %v1227_v58  ;;  %1260 = vmatpush3.bf16.msra.mxu1 %v1259_v59  ;;  %v437_v58 = vld [vmem:[%s1904_s5 + $0x70] sm:$0xff]  ;;  %v438_v59 = vld [vmem:[%s1904_s5 + $0x78] sm:$0xff] }
  0xea   :  { %1230 = vmatprep.subr.bf16.mxu0 %v1229_v62  ;;  %1262 = vmatprep.subr.bf16.mxu1 %v1261_v63  ;;  %v1251_v61 = vpack.c.bf16 %v438_v59, %v437_v58  ;;  %v469_v62 = vld [vmem:[%s1904_s5 + $0x170] sm:$0xff]  ;;  %v470_v63 = vld [vmem:[%s1904_s5 + $0x178] sm:$0xff]  ;;  %v721_v58 = vld [vmem:[%s1907_s8] sm:$0xf] }
  0xeb   :  { %v1283_v0 = vpack.c.bf16 %v470_v63, %v469_v62  ;;  %v887_v63 = vld [vmem:[%s1908_s12] sm:$0xff] }
  0xed   :  { %1232 = vmatpush3.bf16.msra.mxu0 %v1231_v7  ;;  %1264 = vmatpush3.bf16.msra.mxu1 %v1263_v8 }
  0xee   :  { %1234 = vmatprep.subr.bf16.mxu0 %v1233_v11  ;;  %1266 = vmatprep.subr.bf16.mxu1 %v1265_v12  ;;  %v236_v11 = vpop.permute.xlu1 %235 }
  0xf1   :  { %1236 = vmatpush3.bf16.msra.mxu0 %v1235_v19  ;;  %1268 = vmatpush3.bf16.msra.mxu1 %v1267_v20 }
  0xf2   :  { %1238 = vmatprep.subr.bf16.mxu0 %v1237_v23  ;;  %1270 = vmatprep.subr.bf16.mxu1 %v1269_v24  ;;  %v642_v53 = vpop.permute.xlu1 %641 }
  0xf5   :  { %1240 = vmatpush3.bf16.msra.mxu0 %v1239_v31  ;;  %1272 = vmatpush3.bf16.msra.mxu1 %v1271_v32 }
  0xf6   :  { %1242 = vmatprep.subr.bf16.mxu0 %v1241_v34  ;;  %1274 = vmatprep.subr.bf16.mxu1 %v1273_v35 }
  0xf9   :  { %1244 = vmatpush3.bf16.msra.mxu0 %v1243_v39  ;;  %1276 = vmatpush3.bf16.msra.mxu1 %v1275_v40 }
  0xfa   :  { %1246 = vmatprep.subr.bf16.mxu0 %v1245_v44  ;;  %1278 = vmatprep.subr.bf16.mxu1 %v1277_v48 }
  0xfd   :  { %1248 = vmatpush3.bf16.msra.mxu0 %v1247_v49  ;;  %1280 = vmatpush3.bf16.msra.mxu1 %v1279_v52  ;;  %v637_v52 = vld [vmem:[%s1906_s6] sm:$0xff] }
  0xfe   :  { %1250 = vmatprep.subr.bf16.mxu0 %v1249_v56  ;;  %1282 = vmatprep.subr.bf16.mxu1 %v1281_v60  ;;  %v888_v60 = vld [vmem:[%s1908_s12 + $0x8] sm:$0xff] }
 0x101   :  { %1252 = vmatpush3.bf16.msra.mxu0 %v1251_v61  ;;  %1284 = vmatpush3.bf16.msra.mxu1 %v1283_v0  ;;  %v892_v61 = vld [vmem:[%s1908_s12 + $0x28] sm:$0xff]  ;;  %v891_v0 = vld [vmem:[%s1908_s12 + $0x20] sm:$0xff] }
 0x102   :  { %1211 = vmatprep.subr.mxu1 %v1360_v2  ;;  %1285 = vmatprep.subr.bf16.mxu0 %v1362_v36  ;;  %v1288_v62 = vpack.c.bf16 %v892_v61, %v888_v60  ;;  %v935_v36 = vld [vmem:[%s1908_s12 + $0x180] sm:$0xff]  ;;  %v906_v60 = vld [vmem:[%s1908_s12 + $0x98] sm:$0xff] }
 0x103   :  { %v910_v61 = vld [vmem:[%s1908_s12 + $0xb8] sm:$0xff] }
 0x1b5   :  { %v311_v3 = vpop.f32.mrb[2].mxu0  ;;  %v388_v4 = vpop.f32.mrb[2].mxu1 }
 0x1b6   :  { %v312_v5 = vadd.f32 %v311_v3, %v231_v1  ;;  %v389_v6 = vadd.f32 %v388_v4, %v231_v1  ;;  %v313_v7 = vpop.f32.mrb[3].mxu0  ;;  %v390_v8 = vpop.f32.mrb[3].mxu1  ;;  %v896_v3 = vld [vmem:[%s1908_s12 + $0x48] sm:$0xff] }
 0x1b7   :  { %v314_v9 = vadd.f32 %v313_v7, %v231_v1  ;;  %v391_v10 = vadd.f32 %v390_v8, %v231_v1  ;;  %v1290_v1 = vpack.c.bf16 %v891_v0, %v887_v63  ;;  %v900_v4 = vld [vmem:[%s1908_s12 + $0x68] sm:$0xff]  ;;  %v899_v7 = vld [vmem:[%s1908_s12 + $0x60] sm:$0xff]  ;;  %v1328_v63 = vpack.c.bf16 %v910_v61, %v906_v60  ;;  %v905_v0 = vld [vmem:[%s1908_s12 + $0x90] sm:$0xff] }
 0x1b8   :  { %vm399_vm7 = vcmp.ge.f32.partialorder %v312_v5, 0.0  ;;  %v407_v12 = vmul.f32 0.01, %v312_v5  ;;  %vm401_vm8 = vcmp.ge.f32.partialorder %v389_v6, 0.0  ;;  %v409_v13 = vmul.f32 0.01, %v389_v6 }
 0x1b9   :  { %v408_v14 = vmul.f32 0.01, %v314_v9  ;;  %v410_v15 = vmul.f32 0.01, %v391_v10  ;;  %v317_v16 = vpop.f32.mrb[4].mxu0  ;;  %v394_v17 = vpop.f32.mrb[4].mxu1 }
 0x1ba   :  { %v415_v18 = vsel %vm399_vm7, %v312_v5, %v407_v12  ;;  %v417_v19 = vsel %vm401_vm8, %v389_v6, %v409_v13  ;;  %v318_v20 = vadd.f32 %v317_v16, %v236_v11  ;;  %v395_v21 = vadd.f32 %v394_v17, %v236_v11  ;;  %v319_v22 = vpop.f32.mrb[5].mxu0  ;;  %v396_v23 = vpop.f32.mrb[5].mxu1  ;;  %v895_v6 = vld [vmem:[%s1908_s12 + $0x40] sm:$0xff]  ;;  %v916_v16 = vld [vmem:[%s1908_s12 + $0xe8] sm:$0xff] }
 0x1bb   :  { %v320_v24 = vadd.f32 %v319_v22, %v236_v11  ;;  %v397_v25 = vadd.f32 %v396_v23, %v236_v11  ;;  %vm400_vm9 = vcmp.ge.f32.partialorder %v314_v9, 0.0  ;;  %vm402_vm10 = vcmp.ge.f32.partialorder %v391_v10, 0.0  ;;  %v903_v12 = vld [vmem:[%s1908_s12 + $0x80] sm:$0xff]  ;;  %v924_v22 = vld [vmem:[%s1908_s12 + $0x128] sm:$0xff] }
 0x1bc   :  { %v411_v26 = vmul.f32 0.01, %v318_v20  ;;  %v413_v27 = vmul.f32 0.01, %v395_v21  ;;  %v416_v28 = vsel %vm400_vm9, %v314_v9, %v408_v14  ;;  %v418_v29 = vsel %vm402_vm10, %v391_v10, %v410_v15  ;;  %v904_v9 = vld [vmem:[%s1908_s12 + $0x88] sm:$0xff]  ;;  %v907_v13 = vld [vmem:[%s1908_s12 + $0xa0] sm:$0xff] }
 0x1bd   :  { %v412_v30 = vmul.f32 0.01, %v320_v24  ;;  %v414_v31 = vmul.f32 0.01, %v397_v25  ;;  %551 = vmatprep.mubr.f32.mxu0 %v416_v28  ;;  %626 = vmatprep.mubr.f32.mxu1 %v418_v29  ;;  %vm404_vm11 = vcmp.ge.f32.partialorder %v320_v24, 0.0  ;;  %vm406_vm12 = vcmp.ge.f32.partialorder %v397_v25, 0.0 }
 0x1be   :  { %552 = vmatmul.mubr.f32.vlgmr.msra.gmra.mrb[6].mxu0 %v415_v18  ;;  %627 = vmatmul.mubr.f32.vlgmr.msra.gmra.mrb[6].mxu1 %v417_v19  ;;  %vm403_vm13 = vcmp.ge.f32.partialorder %v318_v20, 0.0  ;;  %vm405_vm14 = vcmp.ge.f32.partialorder %v395_v21, 0.0  ;;  %v1292_v5 = vpack.c.bf16 %v900_v4, %v896_v3  ;;  %v1294_v8 = vpack.c.bf16 %v899_v7, %v895_v6  ;;  %v908_v10 = vld [vmem:[%s1908_s12 + $0xa8] sm:$0xff]  ;;  %v911_v18 = vld [vmem:[%s1908_s12 + $0xc0] sm:$0xff]  ;;  %v914_v3 = vld [vmem:[%s1908_s12 + $0xd8] sm:$0xff] }
 0x1bf   :  { %v420_v32 = vsel %vm404_vm11, %v320_v24, %v412_v30  ;;  %v422_v33 = vsel %vm406_vm12, %v397_v25, %v414_v31  ;;  %v419_v34 = vsel %vm403_vm13, %v318_v20, %v411_v26  ;;  %v421_v35 = vsel %vm405_vm14, %v395_v21, %v413_v27  ;;  %v912_v15 = vld [vmem:[%s1908_s12 + $0xc8] sm:$0xff]  ;;  %v915_v19 = vld [vmem:[%s1908_s12 + $0xe0] sm:$0xff]  ;;  %v918_v4 = vld [vmem:[%s1908_s12 + $0xf8] sm:$0xff] }
 0x1c0   :  { %556 = vmatprep.mubr.f32.mxu0 %v420_v32  ;;  %631 = vmatprep.mubr.f32.mxu1 %v422_v33  ;;  %v1296_v11 = vpack.c.bf16 %v908_v10, %v904_v9  ;;  %v1298_v14 = vpack.c.bf16 %v907_v13, %v903_v12  ;;  %v1300_v17 = vpack.c.bf16 %v916_v16, %v912_v15  ;;  %v920_v21 = vld [vmem:[%s1908_s12 + $0x108] sm:$0xff]  ;;  %v919_v24 = vld [vmem:[%s1908_s12 + $0x100] sm:$0xff]  ;;  %v913_v6 = vld [vmem:[%s1908_s12 + $0xd0] sm:$0xff] }
 0x1c1   :  { %v1302_v20 = vpack.c.bf16 %v915_v19, %v911_v18  ;;  %v1304_v23 = vpack.c.bf16 %v924_v22, %v920_v21  ;;  %v923_v25 = vld [vmem:[%s1908_s12 + $0x120] sm:$0xff]  ;;  %v928_v27 = vld [vmem:[%s1908_s12 + $0x148] sm:$0xff]  ;;  %v917_v7 = vld [vmem:[%s1908_s12 + $0xf0] sm:$0xff] }
 0x1c2   :  { %557 = vmatmul.mubr.f32.gmra.mrb[8].mxu0 %v419_v34  ;;  %632 = vmatmul.mubr.f32.gmra.mrb[8].mxu1 %v421_v35  ;;  %v1306_v26 = vpack.c.bf16 %v923_v25, %v919_v24  ;;  %v932_v28 = vld [vmem:[%s1908_s12 + $0x168] sm:$0xff]  ;;  %v927_v30 = vld [vmem:[%s1908_s12 + $0x140] sm:$0xff]  ;;  %v926_v9 = vld [vmem:[%s1908_s12 + $0x138] sm:$0xff]  ;;  %v1334_v10 = vpack.c.bf16 %v917_v7, %v913_v6 }
 0x1c3   :  { %1208 = vmatprep.mubr.msk.f32.mxu0 %vm1363_vm15, %v1360_v2  ;;  %1213 = vmatprep.mubr.msk.f32.mxu1 %vm1363_vm15, %v1360_v2  ;;  %v1308_v29 = vpack.c.bf16 %v932_v28, %v928_v27  ;;  %v931_v31 = vld [vmem:[%s1908_s12 + $0x160] sm:$0xff]  ;;  %v936_v33 = vld [vmem:[%s1908_s12 + $0x188] sm:$0xff]  ;;  %v921_v12 = vld [vmem:[%s1908_s12 + $0x110] sm:$0xff] }
 0x1c4   :  { %v1310_v32 = vpack.c.bf16 %v931_v31, %v927_v30  ;;  %v940_v34 = vld [vmem:[%s1908_s12 + $0x1a8] sm:$0xff]  ;;  %v925_v13 = vld [vmem:[%s1908_s12 + $0x130] sm:$0xff]  ;;  %v934_v15 = vld [vmem:[%s1908_s12 + $0x178] sm:$0xff] }
 0x1c5   :  { %v1312_v35 = vpack.c.bf16 %v940_v34, %v936_v33  ;;  %v1338_v16 = vpack.c.bf16 %v925_v13, %v921_v12  ;;  %v929_v18 = vld [vmem:[%s1908_s12 + $0x150] sm:$0xff]  ;;  %v942_v21 = vld [vmem:[%s1908_s12 + $0x1b8] sm:$0xff]  ;;  %v943_v30 = vld [vmem:[%s1908_s12 + $0x1c0] sm:$0xff] }
 0x1c6   :  { %v933_v19 = vld [vmem:[%s1908_s12 + $0x170] sm:$0xff]  ;;  %v950_v27 = vld [vmem:[%s1908_s12 + $0x1f8] sm:$0xff]  ;;  %v947_v31 = vld [vmem:[%s1908_s12 + $0x1e0] sm:$0xff] }
 0x1c7   :  { %v1342_v22 = vpack.c.bf16 %v933_v19, %v929_v18  ;;  %v937_v24 = vld [vmem:[%s1908_s12 + $0x190] sm:$0xff]  ;;  %v1318_v33 = vpack.c.bf16 %v947_v31, %v943_v30 }
 0x1c8   :  { %v941_v25 = vld [vmem:[%s1908_s12 + $0x1b0] sm:$0xff] }
 0x1c9   :  { %v1346_v28 = vpack.c.bf16 %v941_v25, %v937_v24  ;;  %v949_v34 = vld [vmem:[%s1908_s12 + $0x1f0] sm:$0xff] }
 0x291   :  { %v1153_v37 = vpop.f32.mrb[6].mxu0  ;;  %v1191_v38 = vpop.f32.mrb[6].mxu1 }
 0x292   :  { %v1154_v39 = vpop.f32.mrb[7].mxu0  ;;  %v1192_v40 = vpop.f32.mrb[7].mxu1 }
 0x293   :  { %v1155_v41 = vadd.f32 %v1154_v39, %v1153_v37  ;;  %v1193_v42 = vadd.f32 %v1192_v40, %v1191_v38  ;;  %v939_v37 = vld [vmem:[%s1908_s12 + $0x1a0] sm:$0xff]  ;;  %v944_v39 = vld [vmem:[%s1908_s12 + $0x1c8] sm:$0xff] }
 0x294   :  { %v1314_v38 = vpack.c.bf16 %v939_v37, %v935_v36  ;;  %v948_v40 = vld [vmem:[%s1908_s12 + $0x1e8] sm:$0xff]  ;;  %v809_v36 = vpop.permute.xlu1 %808 }
 0x295   :  { %v629_v43 = vadd.f32 %v1193_v42, %v1155_v41  ;;  %v1156_v44 = vpop.f32.mrb[8].mxu0  ;;  %v1194_v45 = vpop.f32.mrb[8].mxu1  ;;  %v1316_v41 = vpack.c.bf16 %v948_v40, %v944_v39 }
 0x296   :  { %v1157_v46 = vpop.f32.mrb[9].mxu0  ;;  %v1195_v47 = vpop.f32.mrb[9].mxu1 }
 0x297   :  { %v1158_v48 = vadd.f32 %v1157_v46, %v1156_v44  ;;  %v1196_v49 = vadd.f32 %v1195_v47, %v1194_v45  ;;  %v726_v42 = vpop.permute.xlu0 %725  ;;  %v890_v44 = vld [vmem:[%s1908_s12 + $0x18] sm:$0xff] }
 0x298   :  { %v894_v45 = vld [vmem:[%s1908_s12 + $0x38] sm:$0xff] }
 0x299   :  { %v634_v50 = vadd.f32 %v1196_v49, %v1158_v48  ;;  %v889_v48 = vld [vmem:[%s1908_s12 + $0x10] sm:$0xff] }
 0x29a   :  { %v893_v49 = vld [vmem:[%s1908_s12 + $0x30] sm:$0xff] }
 0x29b   :  { %v1286_v51 = vpack.c.bf16 %v634_v50, %v629_v43  ;;  %v898_v50 = vld [vmem:[%s1908_s12 + $0x58] sm:$0xff] }
 0x29d   :  { %1287 = vmatpush3.bf16.msra.mxu0 %v1286_v51  ;;  %v902_v51 = vld [vmem:[%s1908_s12 + $0x78] sm:$0xff] }
 0x29e   :  { %1216 = vmatprep.subr.mxu0 %v1360_v2 }
 0x2a0   :  { %1209 = vmatmul.mubr.msk.f32.vlgmr.msra.gmra.mrb[10].mxu0 %vm644_vm2, %v637_v52 }
 0x2a1   :  { %1218 = vmatprep.mubr.msk.f32.mxu0 %vm1363_vm15, %v1360_v2 }
 0x373   :  { %v714_v54 = vpop.f32.mrb[10].mxu0 }
 0x374   :  { %v715_v55 = vadd.f32 %v714_v54, %v642_v53  ;;  %v1210_v56 = vpop.f32.mrb[11].mxu0  ;;  %v1320_v53 = vpack.c.bf16 %v894_v45, %v890_v44  ;;  %v804_v54 = vld [vmem:[%s1909_s10] sm:$0xf] }
 0x376   :  { %vm718_vm3 = vcmp.ge.f32.partialorder %v715_v55, 0.0  ;;  %v719_v57 = vmul.f32 0.01, %v715_v55 }
 0x378   :  { %v720_v59 = vsel %vm718_vm3, %v715_v55, %v719_v57  ;;  %v1322_v55 = vpack.c.bf16 %v893_v49, %v889_v48  ;;  %v1324_v57 = vpack.c.bf16 %v902_v51, %v898_v50 }
 0x379   :  { %1212 = vmatpush3.msra.mxu1 %v720_v59  ;;  %v901_v59 = vld [vmem:[%s1908_s12 + $0x70] sm:$0xff] }
 0x37a   :  { %1214 = vmatmul.mubr.msk.f32.vlgmr.msra.gmra.mrb[10].mxu1 %vm238_vm6, %v721_v58  ;;  %1289 = vmatprep.subr.bf16.mxu1 %v1288_v62  ;;  %v897_v58 = vld [vmem:[%s1908_s12 + $0x50] sm:$0xff] }
 0x37b   :  { %1015 = vmatprep.mubr.f32.mxu1 %v1360_v2  ;;  %1291 = vmatpush1.bf16.msra.mxu1 %v1290_v1  ;;  %v1326_v62 = vpack.c.bf16 %v901_v59, %v897_v58  ;;  %v909_v1 = vld [vmem:[%s1908_s12 + $0xb0] sm:$0xff] }
 0x37c   :  { %1293 = vmatprep.subr.bf16.mxu1 %v1292_v5  ;;  %v1332_v5 = vpack.c.bf16 %v918_v4, %v914_v3 }
 0x37f   :  { %1295 = vmatpush1.bf16.msra.mxu1 %v1294_v8  ;;  %v922_v8 = vld [vmem:[%s1908_s12 + $0x118] sm:$0xff] }
 0x380   :  { %1297 = vmatprep.subr.bf16.mxu1 %v1296_v11  ;;  %v1336_v11 = vpack.c.bf16 %v926_v9, %v922_v8 }
 0x383   :  { %1299 = vmatpush1.bf16.msra.mxu1 %v1298_v14  ;;  %v930_v14 = vld [vmem:[%s1908_s12 + $0x158] sm:$0xff] }
 0x384   :  { %1301 = vmatprep.subr.bf16.mxu1 %v1300_v17  ;;  %v1340_v17 = vpack.c.bf16 %v934_v15, %v930_v14 }
 0x387   :  { %1303 = vmatpush1.bf16.msra.mxu1 %v1302_v20  ;;  %v938_v20 = vld [vmem:[%s1908_s12 + $0x198] sm:$0xff] }
 0x388   :  { %1305 = vmatprep.subr.bf16.mxu1 %v1304_v23  ;;  %v1344_v23 = vpack.c.bf16 %v942_v21, %v938_v20 }
 0x38b   :  { %1307 = vmatpush1.bf16.msra.mxu1 %v1306_v26  ;;  %v946_v26 = vld [vmem:[%s1908_s12 + $0x1d8] sm:$0xff] }
 0x38c   :  { %1309 = vmatprep.subr.bf16.mxu1 %v1308_v29  ;;  %v1348_v29 = vpack.c.bf16 %v950_v27, %v946_v26 }
 0x38f   :  { %1311 = vmatpush1.bf16.msra.mxu1 %v1310_v32  ;;  %v945_v32 = vld [vmem:[%s1908_s12 + $0x1d0] sm:$0xff] }
 0x390   :  { %1313 = vmatprep.subr.bf16.mxu1 %v1312_v35  ;;  %v1350_v35 = vpack.c.bf16 %v949_v34, %v945_v32 }
 0x393   :  { %1315 = vmatpush1.bf16.msra.mxu1 %v1314_v38 }
 0x394   :  { %1317 = vmatprep.subr.bf16.mxu1 %v1316_v41 }
 0x397   :  { %1319 = vmatpush1.bf16.msra.mxu1 %v1318_v33 }
 0x44d   :  { %v797_v43 = vpop.f32.mrb[10].mxu1 }
 0x44e   :  { %v798_v46 = vadd.f32 %v797_v43, %v726_v42  ;;  %v1215_v47 = vpop.f32.mrb[11].mxu1 }
 0x450   :  { %vm801_vm4 = vcmp.ge.f32.partialorder %v798_v46, 0.0  ;;  %v802_v52 = vmul.f32 0.01, %v798_v46 }
 0x452   :  { %v803_v56 = vsel %vm801_vm4, %v798_v46, %v802_v52 }
 0x453   :  { %1217 = vmatpush3.msk.msra.mxu0 %vm61_vm0, %v803_v56 }
 0x454   :  { %1219 = vmatmul.mubr.msk.f32.vlgmr.msra.gmra.mrb[12].mxu0 %vm57_vm1, %v804_v54  ;;  %1321 = vmatprep.subr.bf16.mxu0 %v1320_v53 }
 0x455   :  { %1323 = vmatpush1.bf16.msra.mxu0 %v1322_v55  ;;  %1086 = vmatprep.mubr.f32.mxu0 %v1360_v2  ;;  %v1330_v2 = vpack.c.bf16 %v909_v1, %v905_v0 }
 0x456   :  { %1325 = vmatprep.subr.bf16.mxu0 %v1324_v57 }
 0x459   :  { %1327 = vmatpush1.bf16.msra.mxu0 %v1326_v62 }
 0x45a   :  { %1329 = vmatprep.subr.bf16.mxu0 %v1328_v63 }
 0x45d   :  { %1331 = vmatpush1.bf16.msra.mxu0 %v1330_v2 }
 0x45e   :  { %1333 = vmatprep.subr.bf16.mxu0 %v1332_v5 }
 0x461   :  { %1335 = vmatpush1.bf16.msra.mxu0 %v1334_v10 }
 0x462   :  { %1337 = vmatprep.subr.bf16.mxu0 %v1336_v11 }
 0x465   :  { %1339 = vmatpush1.bf16.msra.mxu0 %v1338_v16 }
 0x466   :  { %1341 = vmatprep.subr.bf16.mxu0 %v1340_v17 }
 0x469   :  { %1343 = vmatpush1.bf16.msra.mxu0 %v1342_v22 }
 0x46a   :  { %1345 = vmatprep.subr.bf16.mxu0 %v1344_v23 }
 0x46d   :  { %1347 = vmatpush1.bf16.msra.mxu0 %v1346_v28 }
 0x46e   :  { %1349 = vmatprep.subr.bf16.mxu0 %v1348_v29 }
 0x471   :  { %1351 = vmatpush1.bf16.msra.mxu0 %v1350_v35 }
 0x527   :  { %v883_v37 = vpop.f32.mrb[12].mxu0 }
 0x528   :  { %v884_v38 = vadd.f32 %v883_v37, %v809_v36  ;;  %v1220_v39 = vpop.f32.mrb[13].mxu0 }
 0x52a   :  { %1016 = vmatmul.mubr.f32.vlgmr.msra.gmra.mrb[12].mxu1 %v884_v38  ;;  %1087 = vmatmul.mubr.f32.vlgmr.msra.gmra.mrb[14].mxu0 %v884_v38 }
 0x5fd   :  { %v1017_v40 = vpop.f32.mrb[12].mxu1  ;;  %v1088_v41 = vpop.f32.mrb[14].mxu0 }
 0x5fe   :  { %v1019_v42 = vpop.f32.mrb[13].mxu1  ;;  %v1090_v43 = vpop.f32.mrb[15].mxu0 }
 0x5ff   :  { %v1097_v44 = vcombine.low %v1017_v40, %v1019_v42  ;;  %v1098_v45 = vcombine.low %v1088_v41, %v1090_v43 }
 0x601   :  { %1101 = vst [vmem:[%s1910_s13] sm:$0xff] %v1097_v44  ;;  %1102 = vst [vmem:[%s1910_s13 + $0x8] sm:$0xff] %v1098_v45 }

</bundles_post_ra>
